<compile_context>
chip_gen: v6e
topology: v6e:2x2x1
jax: 0.10.0
libtpu: 0.0.40
codegen_flags: <defaults>
</compile_context>

<pallas_src>
import functools

import jax
import jax.numpy as jnp
from jax.experimental import pallas as pl
from jax.experimental.pallas import tpu as pltpu

# ----------------------------- config (small) ---------------------------------
N_MEL = 16           # stands in for 80 mel channels
D_MODEL = 128        # stands in for model_dim=1024 (one full TPU lane -> dense stores)
HEADS = 4            # stands in for 16  (dh = 32)
LAYERS = 2           # stands in for 30
COND_LAYERS = 2      # conditioning-encoder attention depth (real: 6)
N_TEXT_TOKENS = 64   # stands in for 255
NUM_MEL_CODES = 256  # stands in for 8194 (2 x 128 lanes)
START_MEL_TOKEN = 254
STOP_MEL_TOKEN = 255
MAX_TEXT_POS = 64
MAX_MEL_POS = 128
COND_T = 16          # conditioning mel frames
N_CLIPS = 2          # max_conditioning_inputs=2
DIFF_T = 20          # frames of the (synthetic) univnet mel

_VMEM = pl.BlockSpec(memory_space=pltpu.MemorySpace.VMEM)


# ------------------------------ Pallas kernels --------------------------------
def _mel_norm_kernel(x_ref, inv_ref, o_ref):
    # mel = log(clamp(mel, 1e-5)) * (1 / mel_norms)   (TorchMelSpectrogram tail)
    o_ref[...] = jnp.log(jnp.maximum(x_ref[...], 1e-5)) * inv_ref[...]


def mel_normalize_many(power_specs, mel_norms):
    """Normalize several (C, n_mel, T) power spectrograms in ONE pallas_call.

    All inputs are flattened, concatenated, padded to a multiple of 128 and run
    as a single lane-dense (rows, 128) block, multiplying by the precomputed
    reciprocal of mel_norms.
    """
    inv_norm = 1.0 / mel_norms.astype(jnp.float32)
    flats, invs, shapes = [], [], []
    for ps in power_specs:
        C, M, T = ps.shape
        shapes.append((C, M, T))
        flats.append(ps.astype(jnp.float32).reshape(-1))
        invs.append(jnp.broadcast_to(inv_norm[None, :, None], (C, M, T)).reshape(-1))
    x = jnp.concatenate(flats)
    inv = jnp.concatenate(invs)
    total = x.shape[0]
    pad = (-total) % 128
    x = jnp.pad(x, (0, pad), constant_values=1.0)
    inv = jnp.pad(inv, (0, pad), constant_values=1.0)
    rows = (total + pad) // 128
    out = pl.pallas_call(
        _mel_norm_kernel,
        out_shape=jax.ShapeDtypeStruct((rows, 128), jnp.float32),
        in_specs=[_VMEM, _VMEM],
        out_specs=_VMEM,
    )(x.reshape(rows, 128), inv.reshape(rows, 128)).reshape(-1)
    results, off = [], 0
    for (C, M, T) in shapes:
        n = C * M * T
        results.append(out[off:off + n].reshape(C, M, T))
        off += n
    return results


def _linear_kernel(x_ref, w_ref, b_ref, o_ref):
    o_ref[...] = (
        jnp.dot(x_ref[...], w_ref[...], preferred_element_type=jnp.float32)
        + b_ref[...]
    )


def linear(x, w, b):
    """x: (M, K), w: (K, N), b: (1, N) -> (M, N).  1x1 Conv1d == this matmul."""
    M, _ = x.shape
    N = w.shape[1]
    return pl.pallas_call(
        _linear_kernel,
        out_shape=jax.ShapeDtypeStruct((M, N), jnp.float32),
        in_specs=[_VMEM, _VMEM, _VMEM],
        out_specs=_VMEM,
    )(x, w, b)


def _ln(x, g, b, eps=1e-5):
    m = jnp.mean(x, axis=-1, keepdims=True)
    v = jnp.mean((x - m) ** 2, axis=-1, keepdims=True)
    return (x - m) * jax.lax.rsqrt(v + eps) * g + b


def _stack_kernel(*refs, heads, apply_final_ln, with_head):
    """One pre-LN GPT-2 block per grid step; activation stays resident in o_ref.

    grid = (batch, layers).  The output block index is constant along the layer
    axis, so o_ref is the VMEM-resident carrier of x across all layers; the layer
    weights (stacked with a leading L axis) are streamed per grid step.  When
    `with_head`, the mel-head projection runs fused on the last layer and is
    written to a second lane-dense output block.
    """
    if with_head:
        (x_ref, mask_ref, g1, b1, wqkv, bqkv, wproj, bproj,
         g2, b2, wfc, bfc, wpr, bpr, fg, fb, hw, hb,
         o_ref, logits_ref) = refs
    else:
        (x_ref, mask_ref, g1, b1, wqkv, bqkv, wproj, bproj,
         g2, b2, wfc, bfc, wpr, bpr, fg, fb, o_ref) = refs
        hw = hb = logits_ref = None

    layer = pl.program_id(1)
    n_layers = pl.num_programs(1)

    @pl.when(layer == 0)
    def _():
        o_ref[...] = x_ref[...]

    x = o_ref[...]
    S, D = x.shape
    dh = D // heads
    scale = 1.0 / (dh ** 0.5)

    # --- attention (heads batched into single contractions) ---
    h = _ln(x, g1[...], b1[...])
    qkv = jnp.dot(h, wqkv[...], preferred_element_type=jnp.float32) + bqkv[...]

    def split_heads(m):                       # (S, D) -> (heads, S, dh)
        return m.reshape(S, heads, dh).transpose(1, 0, 2)

    q = split_heads(qkv[:, :D])
    k = split_heads(qkv[:, D:2 * D])
    v = split_heads(qkv[:, 2 * D:])

    scores = jnp.einsum('hqd,hkd->hqk', q, k,
                        preferred_element_type=jnp.float32) * scale
    scores = scores + mask_ref[...][None, :, :]          # additive mask, built once
    m_max = jnp.max(scores, axis=-1, keepdims=True)
    e = jnp.exp(scores - m_max)
    denom = jnp.sum(e, axis=-1, keepdims=True)
    probs = e * pl.reciprocal(denom, approx=True)
    ctx = jnp.einsum('hqk,hkd->hqd', probs, v,
                     preferred_element_type=jnp.float32)
    ctx = ctx.transpose(1, 0, 2).reshape(S, D)
    attn = jnp.dot(ctx, wproj[...], preferred_element_type=jnp.float32) + bproj[...]
    x = x + attn

    # --- MLP ---
    h2 = _ln(x, g2[...], b2[...])
    ff = jnp.dot(h2, wfc[...], preferred_element_type=jnp.float32) + bfc[...]
    ff = jax.nn.gelu(ff, approximate=True)     # GPT-2 gelu_new
    ff = jnp.dot(ff, wpr[...], preferred_element_type=jnp.float32) + bpr[...]
    x = x + ff

    if apply_final_ln:
        @pl.when(layer < n_layers - 1)
        def _():
            o_ref[...] = x

        @pl.when(layer == n_layers - 1)
        def _():
            hfin = _ln(x, fg[...], fb[...])
            o_ref[...] = hfin
            if with_head:
                logits_ref[...] = (
                    jnp.dot(hfin, hw[...], preferred_element_type=jnp.float32)
                    + hb[...])
    else:
        o_ref[...] = x


def transformer_stack(x, mask, stack, final_g, final_b, *, heads,
                      apply_final_ln, head_w=None, head_b=None):
    """x: (B, S, D); mask: (S, S) additive; stack: dict of (L, ...) weights.

    Single pallas_call for the whole stack.  Batch axis is 'parallel' (clips /
    megacore), the layer axis is 'arbitrary' (activation resident in VMEM).
    If head_w/head_b are given, the mel-head logits are produced as a second
    output (computed only on the last layer).
    """
    B, S, D = x.shape
    L = stack['wqkv'].shape[0]
    with_head = head_w is not None
    assert not with_head or apply_final_ln

    weight_order = ('ln1_g', 'ln1_b', 'wqkv', 'bqkv', 'wproj', 'bproj',
                    'ln2_g', 'ln2_b', 'wfc', 'bfc', 'wpr', 'bpr')
    weights = [stack[name] for name in weight_order]
    weight_specs = [
        pl.BlockSpec((None,) + w.shape[1:], lambda b, l: (l, 0, 0))
        for w in weights
    ]

    def const_spec(shape):
        return pl.BlockSpec(shape, lambda b, l: (0, 0))

    in_specs = ([pl.BlockSpec((None, S, D), lambda b, l: (b, 0, 0)),
                 const_spec((S, S))]
                + weight_specs
                + [const_spec((1, D)), const_spec((1, D))])
    args = [x, mask, *weights, final_g, final_b]
    out_specs = pl.BlockSpec((None, S, D), lambda b, l: (b, 0, 0))
    out_shape = jax.ShapeDtypeStruct((B, S, D), jnp.float32)
    if with_head:
        V = head_w.shape[1]
        in_specs = in_specs + [const_spec((D, V)), const_spec((1, V))]
        args = args + [head_w, head_b]
        out_specs = (out_specs,
                     pl.BlockSpec((None, S, V), lambda b, l: (b, 0, 0)))
        out_shape = (out_shape, jax.ShapeDtypeStruct((B, S, V), jnp.float32))

    kern = functools.partial(_stack_kernel, heads=heads,
                             apply_final_ln=apply_final_ln, with_head=with_head)
    return pl.pallas_call(
        kern,
        grid=(B, L),
        in_specs=in_specs,
        out_specs=out_specs,
        out_shape=out_shape,
        compiler_params=pltpu.CompilerParams(
            dimension_semantics=("parallel", "arbitrary"),
            vmem_limit_bytes=64 * 1024 * 1024),
    )(*args)


# ------------------------------ parameter init --------------------------------
def _init_linear(key, din, dout, scale=0.02):
    k1, k2 = jax.random.split(key)
    return (jax.random.normal(k1, (din, dout), jnp.float32) * scale,
            jax.random.normal(k2, (1, dout), jnp.float32) * 0.01)


def _init_stack(key, n_layers, d, scale=0.02):
    ks = jax.random.split(key, 8)

    def w(kk, shape):
        return jax.random.normal(kk, shape, jnp.float32) * scale

    def b(kk, shape):
        return jax.random.normal(kk, shape, jnp.float32) * 0.01

    return dict(
        ln1_g=jnp.ones((n_layers, 1, d), jnp.float32),
        ln1_b=jnp.zeros((n_layers, 1, d), jnp.float32),
        wqkv=w(ks[0], (n_layers, d, 3 * d)),
        bqkv=b(ks[1], (n_layers, 1, 3 * d)),
        wproj=w(ks[2], (n_layers, d, d)),
        bproj=b(ks[3], (n_layers, 1, d)),
        ln2_g=jnp.ones((n_layers, 1, d), jnp.float32),
        ln2_b=jnp.zeros((n_layers, 1, d), jnp.float32),
        wfc=w(ks[4], (n_layers, d, 4 * d)),
        bfc=b(ks[5], (n_layers, 1, 4 * d)),
        wpr=w(ks[6], (n_layers, 4 * d, d)),
        bpr=b(ks[7], (n_layers, 1, d)),
    )


def init_params(key):
    keys = jax.random.split(key, 10)
    conv_w, conv_b = _init_linear(keys[0], N_MEL, D_MODEL)
    mel_head_w, mel_head_b = _init_linear(keys[3], D_MODEL, NUM_MEL_CODES)
    return dict(
        conv_w=conv_w, conv_b=conv_b,
        cond_stack=_init_stack(keys[1], COND_LAYERS, D_MODEL),
        gpt_stack=_init_stack(keys[2], LAYERS, D_MODEL),
        final_g=jnp.ones((1, D_MODEL), jnp.float32),
        final_b=jnp.zeros((1, D_MODEL), jnp.float32),
        unit_g=jnp.ones((1, D_MODEL), jnp.float32),    # placeholders (no final LN)
        unit_b=jnp.zeros((1, D_MODEL), jnp.float32),
        mel_head_w=mel_head_w, mel_head_b=mel_head_b,
        text_emb=jax.random.normal(keys[4], (N_TEXT_TOKENS, D_MODEL)) * 0.02,
        mel_emb=jax.random.normal(keys[5], (NUM_MEL_CODES, D_MODEL)) * 0.02,
        text_pos=jax.random.normal(keys[6], (MAX_TEXT_POS, D_MODEL)) * 0.02,
        mel_pos=jax.random.normal(keys[7], (MAX_MEL_POS, D_MODEL)) * 0.02,
        mel_norms=jax.random.uniform(keys[8], (N_MEL,), minval=0.5, maxval=1.5),
    )


# ------------------------------ model pieces ----------------------------------
def get_conditioning(norm_mels, P):
    """norm_mels: (n_clips, n_mel, T) -> (D,) averaged conditioning latent."""
    C, M, T = norm_mels.shape
    # NCL -> (clips*T, n_mel): all clips go through the 1x1 Conv1d in one call.
    x = jnp.transpose(norm_mels, (0, 2, 1)).reshape(C * T, M)
    h = linear(x, P['conv_w'], P['conv_b']).reshape(C, T, D_MODEL)
    mask = jnp.zeros((T, T), jnp.float32)          # non-causal, all frames valid
    h = transformer_stack(h, mask, P['cond_stack'], P['unit_g'], P['unit_b'],
                          heads=HEADS, apply_final_ln=False)
    # ConditioningEncoder takes position 0 of each clip, then mean over clips.
    return jnp.mean(h[:, 0, :], axis=0)


def gpt_hidden(cond_latent, text_tokens, mel_codes, P, *, with_head=False):
    """Final-layernormed hidden states (padded to sublane multiple); optionally
    also the fused mel-head logits."""
    t_emb = P['text_emb'][text_tokens] + P['text_pos'][:text_tokens.shape[0]]
    m_emb = P['mel_emb'][mel_codes] + P['mel_pos'][:mel_codes.shape[0]]
    seq = jnp.concatenate([cond_latent[None, :], t_emb, m_emb],
                          axis=0).astype(jnp.float32)
    S = seq.shape[0]
    S_pad = ((S + 7) // 8) * 8
    seq = jnp.pad(seq, ((0, S_pad - S), (0, 0)))
    # Causal + validity additive mask, built once and reused across all layers.
    row = jnp.arange(S_pad)[:, None]
    col = jnp.arange(S_pad)[None, :]
    keep = (col <= row) & (col < S)
    mask = jnp.where(keep, 0.0, -1e30).astype(jnp.float32)
    if with_head:
        h, logits = transformer_stack(
            seq[None], mask, P['gpt_stack'], P['final_g'], P['final_b'],
            heads=HEADS, apply_final_ln=True,
            head_w=P['mel_head_w'], head_b=P['mel_head_b'])
        return h[0], logits[0]                      # (S_pad, D), (S_pad, V)
    h = transformer_stack(seq[None], mask, P['gpt_stack'],
                          P['final_g'], P['final_b'],
                          heads=HEADS, apply_final_ln=True)
    return h[0]                                     # (S_pad, D)


def fix_autoregressive_output_jax(codes, stop_token):
    """Exact JAX port of fix_autoregressive_output for a 1-D code row."""
    L = codes.shape[0]
    is_stop = codes == stop_token
    has_stop = jnp.any(is_stop)
    idx = jnp.arange(L)
    stm = jnp.min(jnp.where(is_stop, idx, L))
    fixed = jnp.where(is_stop, 83, codes)
    fixed = jnp.where(idx >= stm, 83, fixed)
    fixed = fixed.at[-3].set(45).at[-2].set(45).at[-1].set(248)
    return jnp.where(has_stop, fixed, codes)


def ar_forward(text, cond_power_specs, diff_power_specs, P):
    """Mirrors AR.forward: returns (diffusion_conds, codes, best_latents)."""
    word_count = len(text.split(' '))
    max_mel_tokens = word_count * 13 + 15

    # TODO(synk): VoiceBpeTokenizer has no Pallas equivalent; deterministic stand-in.
    text_tokens = jnp.array([ord(c) % N_TEXT_TOKENS for c in text], jnp.int32)
    text_tokens = jnp.pad(text_tokens, (0, 1))           # F.pad(text_tokens,(0,1))
    n_text = text_tokens.shape[0]

    # TODO(synk): torchaudio MelSpectrogram (STFT) and resample/wav_to_univnet_mel
    # are not implemented; power specs are synthetic inputs.  The log/clamp/
    # mel_norms normalization IS the Pallas kernel (both done in one call).
    cond_mels, diff_mels = mel_normalize_many(
        [cond_power_specs, diff_power_specs], P['mel_norms'])
    auto_latent = get_conditioning(cond_mels, P)
    diffusion_conds = diff_mels[None]

    # TODO(synk): inference_speech (nucleus sampling AR loop) replaced by a single
    # greedy forward pass through the same fused Pallas transformer stack.
    init_codes = jnp.full((max_mel_tokens,), START_MEL_TOKEN, jnp.int32)
    _, logits = gpt_hidden(auto_latent, text_tokens, init_codes, P,
                           with_head=True)                      # fused mel head
    mel_logits = logits[1 + n_text: 1 + n_text + max_mel_tokens]
    codes = jnp.argmax(mel_logits, axis=-1).astype(jnp.int32)
    codes = fix_autoregressive_output_jax(codes, STOP_MEL_TOKEN)
    codes = jnp.clip(codes, 0, NUM_MEL_CODES - 1)        # keep gather in range

    # best_latents: full forward with the fixed codes, return mel-portion latents.
    h1 = gpt_hidden(auto_latent, text_tokens, codes, P)
    best_latents = h1[1 + n_text: 1 + n_text + max_mel_tokens][None]

    return diffusion_conds, codes[None], best_latents


# ---------------------------------- main --------------------------------------
if __name__ == "__main__":
    key = jax.random.PRNGKey(0)
    k_par, k_cond, k_diff = jax.random.split(key, 3)

    params = init_params(k_par)
    text = "hello world test"
    cond_power = jax.random.uniform(k_cond, (N_CLIPS, N_MEL, COND_T),
                                    minval=1e-4, maxval=2.0)
    diff_power = jax.random.uniform(k_diff, (N_CLIPS, N_MEL, DIFF_T),
                                    minval=1e-4, maxval=2.0)

    diffusion_conds, codes, best_latents = ar_forward(
        text, cond_power, diff_power, params)
    jax.block_until_ready((diffusion_conds, codes, best_latents))

    assert diffusion_conds.shape == (1, N_CLIPS, N_MEL, DIFF_T)
    assert codes.shape == (1, len(text.split(' ')) * 13 + 15)
    assert best_latents.shape == (1, codes.shape[1], D_MODEL)
    assert jnp.all(jnp.isfinite(diffusion_conds))
    assert jnp.all(jnp.isfinite(best_latents))
    print("KERNEL_OK")
</pallas_src>

<mosaic_0001>
module attributes {stable_mosaic.version = 11 : i64} {
  func.func @_mel_norm_kernel(%arg0: memref<9x128xf32, #tpu.memory_space<vmem>>, %arg1: memref<9x128xf32, #tpu.memory_space<vmem>>, %arg2: memref<9x128xf32, #tpu.memory_space<vmem>>) attributes {dimension_semantics = [], scalar_prefetch = 0 : i64, scratch_operands = 0 : i64, tpu.core_type = #tpu.core_type<tc>} {
    %c0 = arith.constant 0 : index
    %c0_0 = arith.constant 0 : index
    %0 = vector.load %arg0[%c0, %c0_0] : memref<9x128xf32, #tpu.memory_space<vmem>>, vector<9x128xf32>
    %cst = arith.constant 9.99999974E-6 : f32
    %1 = vector.broadcast %cst : f32 to vector<9x128xf32>
    %2 = arith.maximumf %0, %1 : vector<9x128xf32>
    %3 = math.log %2 : vector<9x128xf32>
    %c0_1 = arith.constant 0 : index
    %c0_2 = arith.constant 0 : index
    %4 = vector.load %arg1[%c0_1, %c0_2] : memref<9x128xf32, #tpu.memory_space<vmem>>, vector<9x128xf32>
    %5 = arith.mulf %3, %4 : vector<9x128xf32>
    %c0_3 = arith.constant 0 : index
    %c0_4 = arith.constant 0 : index
    %6 = vector.load %arg2[%c0_3, %c0_4] : memref<9x128xf32, #tpu.memory_space<vmem>>, vector<9x128xf32>
    tpu.vector_store %arg2[%c0_3, %c0_4], %5 {strides = array<i32>} : memref<9x128xf32, #tpu.memory_space<vmem>>, vector<9x128xf32>,
    return
  }
}

</mosaic_0001>

<bundles_post_ra>
// kernel: tpu_custom_call.1
= control target key start
LH: loop header
LB: loop body
LE: loop exit
PB: predicated region body
PF: predicated region fallthrough
CT: control target
= control target key end

     0   :  { %7 = vsyncpa [#allocation3], 0  ;;  %s185_s0 = inlined_call_operand.hbm [shape: f32[9,128], index: 0, kind: input, shape index: {}]   ;;  %s186_s1 = inlined_call_operand.hbm [shape: f32[9,128], index: 1, kind: input, shape index: {}]   ;;  %s187_s2 = inlined_call_operand.hbm [shape: f32[9,128], index: 2, kind: output, shape index: {}]  }
   0x1   :  { %8 = vsyncpa [#allocation6], 0 }
   0x2   :  { %9 = vsyncpa [#allocation4], 0  ;;  %s147_s9 = smov [#allocation2]  }
   0x3   :  { %s15_s10 = sshll.u32 %s147_s9, 4  ;;  %s16_s10 = int_to_ptr.vmem [resolvable:$true] %s15_s10 }
   0x4   :  { %s89_s11 = scalar_lea.vmem %s16_s10, 256  ;;  %p94_p1 = scmp.lt.s32.totalorder %s16_s10, %s16_s10 }
   0x5   :  { %p90_p0 = scmp.ne.s32.totalorder %s16_s10, %s89_s11  ;;  %p95_p2 = scmp.lt.s32.totalorder %s89_s11, %s89_s11 }
   0x7   :  { %p96_p3 = por %p95_p2, %p94_p1 }
   0x9   :  { %p97_p4 = pnand %p96_p3, %p90_p0 }
   0xb   :  { %100 = shalt.err (!%p97_p4)
}
   0xc   :  { %s148_s12 = smov 128   ;;  %s149_s13 = smov 8  }
   0xd   :  { %21 = dma.hbm_to_vmem [thread:$0]  %s185_s0, 256, %s16_s10, [#allocation3], %s148_s12, %s148_s12, %s149_s13  }
   0xe   :  { %s150_s16 = smov [#allocation5]  }
   0xf   :  { %s27_s17 = sshll.u32 %s150_s16, 4  ;;  %s28_s17 = int_to_ptr.vmem [resolvable:$true] %s27_s17 }
  0x10   :  { %s109_s18 = scalar_lea.vmem %s28_s17, 256  ;;  %p114_p6 = scmp.lt.s32.totalorder %s28_s17, %s28_s17 }
  0x11   :  { %p110_p5 = scmp.ne.s32.totalorder %s28_s17, %s109_s18  ;;  %p115_p7 = scmp.lt.s32.totalorder %s109_s18, %s109_s18 }
  0x13   :  { %p116_p8 = por %p115_p7, %p114_p6 }
  0x15   :  { %p117_p9 = pnand %p116_p8, %p110_p5 }
  0x17   :  { %120 = shalt.err (!%p117_p9)
}
  0x18   :  { %33 = dma.hbm_to_vmem [thread:$0]  %s186_s1, 256, %s28_s17, [#allocation6], %s148_s12, %s148_s12, %s149_s13  }
  0x19   :  { %141 = dma.done.wait [#allocation3], 256  }
  0x1a   :  { %142 = vsyncadd [#allocation3], 4294967040 }
  0x1b   :  { %143 = dma.done.wait [#allocation6], 256  }
  0x1c   :  { %144 = vsyncadd [#allocation6], 4294967040  ;;  %v40_v0 = vld [vmem:[#allocation2] sm:$0xff]  ;;  %v41_v1 = vld [vmem:[#allocation2 + $0x8] sm:$0x1]  ;;  %s151_s0 = smov [#allocation7]  }
  0x1d   :  { %v42_v2 = vmax.f32 %v40_v0, 1e-05  ;;  %v43_v3 = vmax.f32 %v41_v1, 1e-05  ;;  %v48_v5 = vld [vmem:[#allocation5] sm:$0xff]  ;;  %s59_s21 = sshll.u32 %s151_s0, 4  ;;  %s60_s21 = int_to_ptr.vmem [resolvable:$true] %s59_s21 }
  0x1e   :  { %v49_v8 = vld [vmem:[#allocation5 + $0x8] sm:$0x1]  ;;  %s121_s1 = scalar_lea.vmem %s60_s21, 256  ;;  %p126_p11 = scmp.lt.s32.totalorder %s60_s21, %s60_s21 }
  0x1f   :  { %77 = vlog2.f32 %v42_v2  ;;  %p122_p10 = scmp.ne.s32.totalorder %s60_s21, %s121_s1  ;;  %p127_p12 = scmp.lt.s32.totalorder %s121_s1, %s121_s1 }
  0x20   :  { %79 = vlog2.f32 %v43_v3 }
  0x21   :  { %p128_p13 = por %p127_p12, %p126_p11 }
  0x23   :  { %p129_p0 = pnand %p128_p13, %p122_p10 }
  0x2c   :  { %v78_v4 = vpop.eup %77 }
  0x2d   :  { %v80_v6 = vpop.eup %79  ;;  %v45_v7 = vmul.f32 0.6931472, %v78_v4 }
  0x2e   :  { %v47_v9 = vmul.f32 0.6931472, %v80_v6 }
  0x2f   :  { %v50_v10 = vmul.f32 %v48_v5, %v45_v7 }
  0x30   :  { %v51_v11 = vmul.f32 %v49_v8, %v47_v9 }
  0x31   :  { %52 = vst [vmem:[#allocation7] sm:$0xff] %v50_v10 }
  0x32   :  { %53 = vst [vmem:[#allocation7 + $0x8] sm:$0x1] %v51_v11 }
  0x33   :  { %132 = shalt.err (!%p129_p0)
}
  0x34   :  { %65 = dma.vmem_to_hbm [thread:$0]  %s60_s21, 256, %s187_s2, [#allocation4], %s148_s12, %s148_s12, %s149_s13  }
  0x35   :  { %145 = dma.done.wait [#allocation4], 256  }
  0x36   :  { %146 = vsyncadd [#allocation4], 4294967040 }
  0x37   :  { %69 = vsyncpa [#allocation3], 1 }
  0x38   :  { %70 = vsyncpa [#allocation6], 1 }
  0x39   :  { %71 = vsyncpa [#allocation4], 1 }

</bundles_post_ra>
